<compile_context>
chip_gen: v7x
topology: tpu7x:2x2x1
jax: 0.10.0
libtpu: 0.0.40
codegen_flags: <defaults>
</compile_context>

<pallas_src>
import math

import jax
import jax.numpy as jnp
from jax.experimental import pallas as pl
from jax.experimental.pallas import tpu as pltpu


# ---------------------------------------------------------------------------
# Kernels
# ---------------------------------------------------------------------------

def _make_radix_kernel(radix, groups, k):
    """Build the radix > 1 kernel for static (radix, groups, K).

    x_ref: (TB, groups, radix*K)   -- natural [g][r][k] row layout (free view).
    o_ref: (TB, radix*groups*K)    -- flat [r][g][k] PyTorch output row.
    """
    gk = groups * k

    def load_radix_chunk(x_ref, r):
        # (TB, groups, K) lane window -> lane-dense (TB, groups*K) in [g][k]
        # order.  Integer sublane indexing + lane-axis concat only (no reshape
        # across tiled dims), so it lowers robustly for any K.
        win = x_ref[:, :, r * k:(r + 1) * k].astype(jnp.float32)
        if groups == 1:
            return win[:, 0, :]
        return jnp.concatenate([win[:, g, :] for g in range(groups)], axis=-1)

    if radix == 2:
        def kernel(x_ref, o_ref):
            a0 = load_radix_chunk(x_ref, 0)
            a1 = load_radix_chunk(x_ref, 1)
            z = a0 - a1
            # softmax over a pair == [sigmoid(z), 1 - sigmoid(z)]; stable form,
            # exact divide (memory-bound kernel: the divide is free).
            e = jnp.exp(-jnp.abs(z))
            t = 1.0 / (1.0 + e)
            p0 = jnp.where(z >= 0, t, 1.0 - t)
            o_ref[:, :gk] = p0.astype(o_ref.dtype)
            o_ref[:, gk:] = (1.0 - p0).astype(o_ref.dtype)
        return kernel

    def kernel(x_ref, o_ref):
        # General radix: per-r lane-dense chunks (no full padded 4-D block).
        a = [load_radix_chunk(x_ref, r) for r in range(radix)]
        m = a[0]
        for r in range(1, radix):
            m = jnp.maximum(m, a[r])
        e = [jnp.exp(a[r] - m) for r in range(radix)]
        s = e[0]
        for r in range(1, radix):
            s = s + e[r]
        inv = 1.0 / s                                    # exact divide
        for r in range(radix):
            o_ref[:, r * gk:(r + 1) * gk] = (e[r] * inv).astype(o_ref.dtype)
    return kernel


def _sigmoid_kernel(x_ref, o_ref):
    x = x_ref[...].astype(jnp.float32)
    e = jnp.exp(-jnp.abs(x))                             # stable: no overflow
    t = 1.0 / (1.0 + e)
    o_ref[...] = jnp.where(x >= 0, t, 1.0 - t).astype(o_ref.dtype)


# ---------------------------------------------------------------------------
# Tiling helpers
# ---------------------------------------------------------------------------

_VMEM_LIMIT = 32 * 1024 * 1024     # within scoped/physical VMEM on v5e/v6e/v7x
_BLOCK_TARGET = 4 << 20            # per-block in+out+scratch bytes target


def _round_up(v, m):
    return -(-v // m) * m


def _num_tensorcores():
    """TensorCores per chip (v5e/v6e: 1, v7x: 2).  Conservative default: 1."""
    try:
        info = pltpu.get_tpu_info()
    except Exception:
        return 1
    for attr in ("num_cores", "core_count", "num_tensorcores",
                 "tensorcore_count", "cores_per_chip", "num_cores_per_chip"):
        v = getattr(info, attr, None)
        if isinstance(v, int) and v > 0:
            return v
    return 1


def _choose_row_tile(rows, bytes_per_row, num_tc, target=_BLOCK_TARGET):
    """Rows folded into one block: big enough to amortize the ~0.35us/step grid
    overhead; split into >= num_tc steps only when >1 TensorCore exists (v7x);
    a multiple of 8 (or the full extent) because the row axis is the
    second-minor dim of the 2-D output block."""
    t = max(1, min(rows, int(target) // max(int(bytes_per_row), 1)))
    if num_tc > 1 and rows > 1:
        t = min(t, -(-rows // num_tc))
    if t >= rows or rows <= 8:
        return rows
    return max(8, (t // 8) * 8)


# ---------------------------------------------------------------------------
# Wrapper (forward pass of RSoftmax)
# ---------------------------------------------------------------------------

def rsoftmax(x, radix, groups):
    """x: (B, C, H, W).  radix>1 -> (B, C*H*W) radix-softmax; radix==1 -> sigmoid(x)."""
    batch = x.shape[0]
    n = math.prod(x.shape[1:])
    itemsize = jnp.dtype(x.dtype).itemsize
    num_tc = _num_tensorcores()
    cparams = pltpu.CompilerParams(dimension_semantics=("parallel",),
                                   vmem_limit_bytes=_VMEM_LIMIT)

    if radix > 1:
        if n % (groups * radix) != 0:
            raise ValueError(
                f"C*H*W={n} must be divisible by groups*radix={groups * radix}")
        k = n // (groups * radix)
        gk = groups * k

        # Free view of the natural NCHW layout: each row is [g][r][k].
        xg = x.reshape(batch, groups, radix * k)

        # Per-batch-row VMEM: padded input slab + dense output row + f32 chunks.
        in_row = _round_up(groups, 8) * _round_up(radix * k, 128) * itemsize
        out_row = _round_up(n, 128) * itemsize
        scratch_row = (radix + 2) * _round_up(gk, 128) * 4
        tb = _choose_row_tile(batch, in_row + out_row + scratch_row, num_tc)

        out = pl.pallas_call(
            _make_radix_kernel(radix, groups, k),
            out_shape=jax.ShapeDtypeStruct((batch, n), x.dtype),
            grid=(pl.cdiv(batch, tb),),
            in_specs=[pl.BlockSpec((tb, groups, radix * k), lambda b: (b, 0, 0))],
            out_specs=pl.BlockSpec((tb, n), lambda b: (b, 0)),
            compiler_params=cparams,
        )(xg)
        # Rows already come out in [r][g][k] order == PyTorch .reshape(batch, -1).
        return out

    # radix == 1: elementwise sigmoid, original shape preserved.
    # TODO(synk): for few-KiB 1x1 gate tensors the whole call is launch-bound;
    # a plain jax.nn.sigmoid dispatch could beat any custom kernel there.
    total = batch * n
    lane = next((c for c in (4096, 2048, 1024, 512, 256, 128) if total % c == 0),
                None)
    if lane is None:                      # odd total: fall back to (B, n) rows
        rows, lane = batch, n
    else:
        rows = total // lane
    flat = x.reshape(rows, lane)
    row_bytes = 4 * _round_up(lane, 128) * max(itemsize, 4)
    tr = _choose_row_tile(rows, row_bytes, num_tc)
    out = pl.pallas_call(
        _sigmoid_kernel,
        out_shape=jax.ShapeDtypeStruct((rows, lane), x.dtype),
        grid=(pl.cdiv(rows, tr),),
        in_specs=[pl.BlockSpec((tr, lane), lambda b: (b, 0))],
        out_specs=pl.BlockSpec((tr, lane), lambda b: (b, 0)),
        compiler_params=cparams,
    )(flat)
    return out.reshape(x.shape)


# ---------------------------------------------------------------------------
# Pure-JAX reference (mirrors the PyTorch module)
# ---------------------------------------------------------------------------

def _rsoftmax_ref(x, radix, groups):
    batch = x.shape[0]
    if radix > 1:
        flat = x.reshape(batch, -1)
        k = flat.shape[1] // (groups * radix)
        xt = flat.reshape(batch, groups, radix, k).transpose(0, 2, 1, 3)
        return jax.nn.softmax(xt, axis=1).reshape(batch, -1)
    return jax.nn.sigmoid(x)


if __name__ == "__main__":
    key = jax.random.PRNGKey(0)
    keys = jax.random.split(key, 4)
    # Exact divide / stable sigmoid now -> tight tolerance (no approx recip).
    tol = dict(atol=1e-5, rtol=1e-5)

    # 1) Canonical ResNeSt split-attention gate: radix=2, groups=4, 1x1 spatial.
    radix, groups = 2, 4
    x = jax.random.normal(keys[0], (4, 256, 1, 1), dtype=jnp.float32) * 4.0
    out = jax.block_until_ready(rsoftmax(x, radix, groups))
    ref = _rsoftmax_ref(x, radix, groups)
    assert out.shape == (4, 256)
    assert jnp.allclose(out, ref, **tol), float(jnp.max(jnp.abs(out - ref)))

    # 2) General-radix path (radix=4, groups=2) with spatial extent.
    radix, groups = 4, 2
    x = jax.random.normal(keys[1], (2, 32, 4, 4), dtype=jnp.float32) * 4.0
    out = jax.block_until_ready(rsoftmax(x, radix, groups))
    ref = _rsoftmax_ref(x, radix, groups)
    assert out.shape == (2, 512)
    assert jnp.allclose(out, ref, **tol), float(jnp.max(jnp.abs(out - ref)))

    # 3) Non-128-aligned groups*K (masked-edge stores) and batch not a mult of 8.
    radix, groups = 2, 3
    x = jax.random.normal(keys[2], (3, 60, 2, 2), dtype=jnp.float32) * 4.0
    out = jax.block_until_ready(rsoftmax(x, radix, groups))
    ref = _rsoftmax_ref(x, radix, groups)
    assert out.shape == (3, 240)
    assert jnp.allclose(out, ref, **tol), float(jnp.max(jnp.abs(out - ref)))

    # 4) radix == 1: elementwise sigmoid, shape preserved.
    x = jax.random.normal(keys[3], (2, 128, 1, 1), dtype=jnp.float32) * 4.0
    out = jax.block_until_ready(rsoftmax(x, 1, 4))
    ref = _rsoftmax_ref(x, 1, 4)
    assert out.shape == x.shape
    assert jnp.allclose(out, ref, **tol), float(jnp.max(jnp.abs(out - ref)))

    print("KERNEL_OK")
</pallas_src>

<mosaic_0001>
module attributes {stable_mosaic.version = 11 : i64} {
  func.func @kernel(%arg0: i32, %arg1: memref<4x4x64xf32, #tpu.memory_space<vmem>>, %arg2: memref<4x256xf32, #tpu.memory_space<vmem>>) attributes {dimension_semantics = [#tpu.dimension_semantics<parallel>], iteration_bounds = array<i64: 1>, scalar_prefetch = 0 : i64, scratch_operands = 0 : i64, tpu.core_type = #tpu.core_type<tc>, window_params = [{transform_indices = @transform_0, window_bounds = array<i64: 4, 4, 64>}, {transform_indices = @transform_1, window_bounds = array<i64: 4, 256>}]} {
    %c0 = arith.constant 0 : index
    %c0_0 = arith.constant 0 : index
    %c0_1 = arith.constant 0 : index
    %0 = vector.load %arg1[%c0, %c0_0, %c0_1] : memref<4x4x64xf32, #tpu.memory_space<vmem>>, vector<4x4x32xf32>
    %1 = vector.extract_strided_slice %0 {offsets = [0, 0, 0], sizes = [4, 1, 32], strides = [1, 1, 1]} : vector<4x4x32xf32> to vector<4x1x32xf32>
    %2 = vector.shape_cast %1 : vector<4x1x32xf32> to vector<4x32xf32>
    %3 = vector.extract_strided_slice %0 {offsets = [0, 1, 0], sizes = [4, 1, 32], strides = [1, 1, 1]} : vector<4x4x32xf32> to vector<4x1x32xf32>
    %4 = vector.shape_cast %3 : vector<4x1x32xf32> to vector<4x32xf32>
    %5 = vector.extract_strided_slice %0 {offsets = [0, 2, 0], sizes = [4, 1, 32], strides = [1, 1, 1]} : vector<4x4x32xf32> to vector<4x1x32xf32>
    %6 = vector.shape_cast %5 : vector<4x1x32xf32> to vector<4x32xf32>
    %7 = vector.extract_strided_slice %0 {offsets = [0, 3, 0], sizes = [4, 1, 32], strides = [1, 1, 1]} : vector<4x4x32xf32> to vector<4x1x32xf32>
    %8 = vector.shape_cast %7 : vector<4x1x32xf32> to vector<4x32xf32>
    %9 = tpu.concatenate %2, %4, %6, %8 in 1 : vector<4x32xf32>, vector<4x32xf32>, vector<4x32xf32>, vector<4x32xf32> -> vector<4x128xf32>
    %c0_2 = arith.constant 0 : index
    %c0_3 = arith.constant 0 : index
    %c32 = arith.constant 32 : index
    %10 = vector.load %arg1[%c0_2, %c0_3, %c32] : memref<4x4x64xf32, #tpu.memory_space<vmem>>, vector<4x4x32xf32>
    %11 = vector.extract_strided_slice %10 {offsets = [0, 0, 0], sizes = [4, 1, 32], strides = [1, 1, 1]} : vector<4x4x32xf32> to vector<4x1x32xf32>
    %12 = vector.shape_cast %11 : vector<4x1x32xf32> to vector<4x32xf32>
    %13 = vector.extract_strided_slice %10 {offsets = [0, 1, 0], sizes = [4, 1, 32], strides = [1, 1, 1]} : vector<4x4x32xf32> to vector<4x1x32xf32>
    %14 = vector.shape_cast %13 : vector<4x1x32xf32> to vector<4x32xf32>
    %15 = vector.extract_strided_slice %10 {offsets = [0, 2, 0], sizes = [4, 1, 32], strides = [1, 1, 1]} : vector<4x4x32xf32> to vector<4x1x32xf32>
    %16 = vector.shape_cast %15 : vector<4x1x32xf32> to vector<4x32xf32>
    %17 = vector.extract_strided_slice %10 {offsets = [0, 3, 0], sizes = [4, 1, 32], strides = [1, 1, 1]} : vector<4x4x32xf32> to vector<4x1x32xf32>
    %18 = vector.shape_cast %17 : vector<4x1x32xf32> to vector<4x32xf32>
    %19 = tpu.concatenate %12, %14, %16, %18 in 1 : vector<4x32xf32>, vector<4x32xf32>, vector<4x32xf32>, vector<4x32xf32> -> vector<4x128xf32>
    %20 = arith.subf %9, %19 : vector<4x128xf32>
    %21 = math.absf %20 : vector<4x128xf32>
    %cst = arith.constant 0.000000e+00 : f32
    %22 = vector.broadcast %cst : f32 to vector<4x128xf32>
    %23 = arith.subf %22, %21 : vector<4x128xf32>
    %24 = math.exp %23 : vector<4x128xf32>
    %cst_4 = arith.constant 1.000000e+00 : f32
    %25 = vector.broadcast %cst_4 : f32 to vector<4x128xf32>
    %26 = arith.addf %25, %24 : vector<4x128xf32>
    %cst_5 = arith.constant 1.000000e+00 : f32
    %27 = vector.broadcast %cst_5 : f32 to vector<4x128xf32>
    %28 = arith.divf %27, %26 : vector<4x128xf32>
    %cst_6 = arith.constant 0.000000e+00 : f32
    %29 = vector.broadcast %cst_6 : f32 to vector<4x128xf32>
    %30 = arith.cmpf oge, %20, %29 : vector<4x128xf32>
    %cst_7 = arith.constant 1.000000e+00 : f32
    %31 = vector.broadcast %cst_7 : f32 to vector<4x128xf32>
    %32 = arith.subf %31, %28 : vector<4x128xf32>
    %33 = arith.select %30, %28, %32 : vector<4x128xi1>, vector<4x128xf32>
    %c0_8 = arith.constant 0 : index
    %c0_9 = arith.constant 0 : index
    %34 = vector.load %arg2[%c0_8, %c0_9] : memref<4x256xf32, #tpu.memory_space<vmem>>, vector<4x128xf32>
    tpu.vector_store %arg2[%c0_8, %c0_9], %33 {strides = array<i32>} : memref<4x256xf32, #tpu.memory_space<vmem>>, vector<4x128xf32>,
    %cst_10 = arith.constant 1.000000e+00 : f32
    %35 = vector.broadcast %cst_10 : f32 to vector<4x128xf32>
    %36 = arith.subf %35, %33 : vector<4x128xf32>
    %c0_11 = arith.constant 0 : index
    %c128 = arith.constant 128 : index
    %37 = vector.load %arg2[%c0_11, %c128] : memref<4x256xf32, #tpu.memory_space<vmem>>, vector<4x128xf32>
    tpu.vector_store %arg2[%c0_11, %c128], %36 {strides = array<i32>} : memref<4x256xf32, #tpu.memory_space<vmem>>, vector<4x128xf32>,
    return
  }
  func.func @transform_0(%arg0: i32) -> (i32, i32, i32) {
    %c0_i32 = arith.constant 0 : i32
    %c0_i32_0 = arith.constant 0 : i32
    %c0_i32_1 = arith.constant 0 : i32
    return %arg0, %c0_i32, %c0_i32_0 : i32, i32, i32
  }
  func.func @transform_1(%arg0: i32) -> (i32, i32) {
    %c0_i32 = arith.constant 0 : i32
    %c0_i32_0 = arith.constant 0 : i32
    return %arg0, %c0_i32 : i32, i32
  }
}

</mosaic_0001>

<bundles_post_ra>
// kernel: tpu_custom_call.1
= control target key start
LH: loop header
LB: loop body
LE: loop exit
PB: predicated region body
PF: predicated region fallthrough
CT: control target
= control target key end

     0   :  { %6 = vsyncpa [#allocation3], 0  ;;  %s230_s0 = inlined_call_operand.hbm [shape: f32[4,4,64], index: 0, kind: input, shape index: {}]   ;;  %s231_s1 = inlined_call_operand.hbm [shape: f32[4,256], index: 1, kind: output, shape index: {}]  }
   0x1   :  { %7 = vsyncpa [#allocation4], 0  ;;  %s174_s6 = smov [#allocation2]   ;;  %s126_s10 = scalar_lea.hbm %s230_s0, 256 }
   0x2   :  { %s13_s7 = sshll.u32 %s174_s6, 4  ;;  %p127_p0 = scmp.ne.s32.totalorder %s230_s0, %s126_s10  ;;  %s14_s7 = int_to_ptr.vmem [resolvable:$true] %s13_s7 }
   0x3   :  { %p130_p1 = scmp.lt.u32.totalorder %s126_s10, %s230_s0 }
   0x5   :  { %p132_p2 = pnand %p130_p1, %p127_p0 }
   0x7   :  { %135 = shalt.err (!%p132_p2)
}
   0x8   :  { %s136_s15 = scalar_lea.vmem %s14_s7, 256  ;;  %p141_p4 = scmp.lt.s32.totalorder %s14_s7, %s14_s7 }
   0x9   :  { %p137_p3 = scmp.ne.s32.totalorder %s14_s7, %s136_s15  ;;  %p142_p5 = scmp.lt.s32.totalorder %s136_s15, %s136_s15 }
   0xb   :  { %p143_p6 = por %p142_p5, %p141_p4 }
   0xd   :  { %p144_p7 = pnand %p143_p6, %p137_p3 }
   0xf   :  { %147 = shalt.err (!%p144_p7)
}
  0x10   :  { %s175_s16 = smov 64   ;;  %s176_s17 = smov 4  }
  0x11   :  { %19 = dma.hbm_to_vmem [thread:$0]  %s230_s0, 256, %s14_s7, [#allocation3], %s175_s16, %s175_s16, %s176_s17  }
  0x12   :  { %170 = dma.done.wait [#allocation3], 256  }
  0x13   :  { %171 = vsyncadd [#allocation3], 4294967040  ;;  %vm32_vm0 = vcmask 1041409   ;;  %vm35_vm1 = vcmask 1042434   ;;  %vm38_vm2 = vcmask 1043459   ;;  %s177_s0 = smov 32  }
  0x14   :  { %v23_v0 = vld [vmem:[#allocation2] sm:$0xf]  ;;  %v24_v1 = vld [vmem:[#allocation2 + $0x4] sm:$0xf]  ;;  %v25_v2 = vld [vmem:[#allocation2 + $0x8] sm:$0xf] }
  0x15   :  { %v26_v3 = vld [vmem:[#allocation2 + $0xc] sm:$0xf]  ;;  %v50_v4 = vrot.slane %v23_v0, 2  ;;  %v51_v5 = vrot.slane %v24_v1, 1  ;;  %v41_v6 = vrot.slane %v23_v0, 1  ;;  %v43_v7 = vrot.slane %v25_v2, 7 }
  0x16   :  { %v54_v8 = vrot.slane %v26_v3, 7  ;;  %v45_v9 = vrot.slane %v26_v3, 6  ;;  %v31_v10 = vrot.slane %v24_v1, 7  ;;  %v34_v11 = vrot.slane %v25_v2, 6  ;;  %s178_s20 = smov 96   ;;  %s179_s21 = smov [#allocation5]  }
  0x17   :  { %v52_v12 = vsel %vm32_vm0, %v51_v5, %v50_v4  ;;  %v42_v13 = vsel %vm32_vm0, %v24_v1, %v41_v6  ;;  %v37_v14 = vrot.slane %v26_v3, 5  ;;  %v59_v15 = vrot.slane %v23_v0, 3  ;;  %s107_s22 = sshll.u32 %s179_s21, 4  ;;  %s108_s22 = int_to_ptr.vmem [resolvable:$true] %s107_s22 }
  0x18   :  { %v53_v16 = vsel %vm35_vm1, %v25_v2, %v52_v12  ;;  %v44_v17 = vsel %vm35_vm1, %v43_v7, %v42_v13  ;;  %v33_v18 = vsel %vm32_vm0, %v31_v10, %v23_v0  ;;  %v60_v19 = vrot.slane %v24_v1, 2  ;;  %s148_s23 = scalar_lea.vmem %s108_s22, 128  ;;  %p153_p9 = scmp.lt.s32.totalorder %s108_s22, %s108_s22 }
  0x19   :  { %v55_v20 = vsel %vm38_vm2, %v54_v8, %v53_v16  ;;  %v46_v21 = vsel %vm38_vm2, %v45_v9, %v44_v17  ;;  %v36_v22 = vsel %vm35_vm1, %v34_v11, %v33_v18  ;;  %v62_v23 = vrot.slane %v25_v2, 1  ;;  %p149_p8 = scmp.ne.s32.totalorder %s108_s22, %s148_s23  ;;  %p154_p10 = scmp.lt.s32.totalorder %s148_s23, %s148_s23 }
  0x1a   :  { %56 = vrot.lane.b32.xlu1 %v55_v20, %s175_s16  ;;  %47 = vrot.lane.b32.xlu0 %v46_v21, %s177_s0  ;;  %v61_v24 = vsel %vm32_vm0, %v60_v19, %v59_v15  ;;  %v39_v25 = vsel %vm38_vm2, %v37_v14, %v36_v22  ;;  %vm68_vm3 = vcmask 261120   ;;  %vm70_vm4 = vcmask 523264  }
  0x1b   :  { %v63_v26 = vsel %vm35_vm1, %v62_v23, %v61_v24  ;;  %vm72_vm5 = vcmask 785408   ;;  %p155_p11 = por %p154_p10, %p153_p9 }
  0x1c   :  { %v64_v27 = vsel %vm38_vm2, %v26_v3, %v63_v26 }
  0x1d   :  { %p156_p12 = pnand %p155_p11, %p149_p8 }
  0x1e   :  { %78 = vrot.lane.b32.xlu1 %v55_v20, %s177_s0  ;;  %74 = vrot.lane.b32.xlu0 %v39_v25, %s178_s20 }
  0x22   :  { %81 = vrot.lane.b32.xlu1 %v64_v27, %s175_s16  ;;  %65 = vrot.lane.b32.xlu0 %v64_v27, %s178_s20 }
  0x8c   :  { %v57_v28 = vpop.permute.xlu1 %56  ;;  %v48_v29 = vpop.permute.xlu0 %47 }
  0x8d   :  { %v69_v32 = vsel %vm68_vm3, %v39_v25, %v48_v29 }
  0x8e   :  { %v71_v37 = vsel %vm70_vm4, %v69_v32, %v57_v28 }
  0x90   :  { %v79_v30 = vpop.permute.xlu1 %78  ;;  %v75_v31 = vpop.permute.xlu0 %74 }
  0x91   :  { %v84_v33 = vsel %vm68_vm3, %v75_v31, %v46_v21 }
  0x92   :  { %v85_v35 = vsel %vm70_vm4, %v84_v33, %v79_v30 }
  0x94   :  { %v82_v34 = vpop.permute.xlu1 %81  ;;  %v66_v36 = vpop.permute.xlu0 %65 }
  0x95   :  { %v86_v38 = vsel %vm72_vm5, %v85_v35, %v82_v34  ;;  %v73_v39 = vsel %vm72_vm5, %v71_v37, %v66_v36 }
  0x96   :  { %v87_v40 = vsub.f32 %v73_v39, %v86_v38 }
  0x98   :  { %v88_v41 = vand.u32 2147483647, %v87_v40  ;;  %vm95_vm6 = vcmp.ge.f32.partialorder %v87_v40, 0.0 }
  0x9a   :  { %v89_v42 = vsub.f32 0.0, %v88_v41 }
  0x9c   :  { %v90_v43 = vmul.f32 1.442695, %v89_v42 }
  0x9e   :  { %122 = vpow2.f32 %v90_v43 }
  0xa8   :  { %v123_v44 = vpop.eup %122 }
  0xa9   :  { %v92_v45 = vadd.f32 1.0, %v123_v44 }
  0xab   :  { %124 = vrcp.f32 %v92_v45 }
  0xb5   :  { %v125_v46 = vpop.eup %124 }
  0xb6   :  { %v96_v47 = vsub.f32 1.0, %v125_v46 }
  0xb8   :  { %v97_v48 = vsel %vm95_vm6, %v125_v46, %v96_v47 }
  0xb9   :  { %98 = vst [vmem:[#allocation5] sm:$0xf] %v97_v48  ;;  %v99_v49 = vsub.f32 1.0, %v97_v48 }
  0xbb   :  { %100 = vst [vmem:[#allocation5 + $0x4] sm:$0xf] %v99_v49 }
  0xbc   :  { %159 = shalt.err (!%p156_p12)
}
  0xbd   :  { %s160_s26 = scalar_lea.hbm %s231_s1, 128 }
  0xbe   :  { %p161_p13 = scmp.ne.s32.totalorder %s231_s1, %s160_s26  ;;  %p164_p0 = scmp.lt.u32.totalorder %s160_s26, %s231_s1 }
  0xc0   :  { %p166_p1 = pnand %p164_p0, %p161_p13 }
  0xc2   :  { %169 = shalt.err (!%p166_p1)
}
  0xc3   :  { %110 = dma.vmem_to_hbm [thread:$0]  %s108_s22, 128, %s231_s1, [#allocation4]  }
  0xc4   :  { %172 = dma.done.wait [#allocation4], 128  }
  0xc5   :  { %173 = vsyncadd [#allocation4], 4294967168 }
  0xc6   :  { %114 = vsyncpa [#allocation3], 1 }
  0xc7   :  { %115 = vsyncpa [#allocation4], 1 }

</bundles_post_ra>
